<compile_context>
chip_gen: v6e
topology: v6e:2x2x1
jax: 0.10.0
libtpu: 0.0.40
codegen_flags: <defaults>
</compile_context>

<pallas_src>
import functools

import jax
import jax.numpy as jnp
from jax import lax
from jax.experimental import pallas as pl
from jax.experimental.pallas import tpu as pltpu


def _make_fused_kernel(H, W, planes, compute_dtype):
    """Fused Conv3x3+ReLU -> Conv3x3+ReLU -> ConvTranspose(k3,s2,p1,op1)+ReLU."""
    HW = H * W
    M = W + 1                      # halo width = |largest tap shift| (= W + 1)
    LBUF = HW + 2 * M              # [left halo | image | right halo]
    c_in = 2 * planes
    c_out = planes // 2

    def kernel(x_ref, m_ref, w1_ref, b1_ref, w2_ref, b2_ref, w3_ref, b3_ref,
               o_ref, buf):
        f32 = jnp.float32
        mask_l = m_ref[0:1, :]     # (1, HW): col != 0     (kills row wrap, kx=0)
        mask_r = m_ref[1:2, :]     # (1, HW): col != W - 1 (kills row wrap, kx=2)

        # Re-zero the halos every grid step (tiny stores; a pl.when(pid==0)
        # init would miss the second core's scratch under megacore sharding).
        buf[:, 0:M] = jnp.zeros((c_in, M), f32)
        buf[:, M + HW:LBUF] = jnp.zeros((c_in, M), f32)

        # Stage-1 input lands directly in the halo buffer's interior.
        buf[:, M:M + HW] = x_ref[0]

        def conv3x3_relu(c, w_mat, bias):
            # Reads activation rows [0:c) of buf.  w_mat: (Cout, 9*c) with
            # column order t*c + ci, t = 3*ky + kx.
            def tap_slab(ky, kx):
                d = (ky - 1) * W + (kx - 1)
                s = buf[0:c, M + d:M + d + HW]
                if kx == 0:
                    s = s * mask_l
                elif kx == 2:
                    s = s * mask_r
                return s

            if 3 * c < 128:
                # Small K: a single MXU push with K = 9*c.
                slab = jnp.concatenate(
                    [tap_slab(ky, kx) for ky in range(3) for kx in range(3)],
                    axis=0)                                        # (9*c, HW)
                acc = jnp.dot(w_mat, slab.astype(compute_dtype),
                              preferred_element_type=f32)
            else:
                # Large K: 3 pushes of K = 3*c (one per tap row); init acc
                # from the first dot (no zeros + add).
                acc = None
                for ky in range(3):
                    slab = jnp.concatenate(
                        [tap_slab(ky, kx) for kx in range(3)], axis=0)
                    part = jnp.dot(w_mat[:, ky * 3 * c:(ky + 1) * 3 * c],
                                   slab.astype(compute_dtype),
                                   preferred_element_type=f32)
                    acc = part if acc is None else acc + part
            return jnp.maximum(acc + bias, 0.0)

        # ---- stage 1: Conv3x3(2p -> p) + ReLU -----------------------------
        buf[0:planes, M:M + HW] = conv3x3_relu(c_in, w1_ref[...], b1_ref[...])

        # ---- stage 2: Conv3x3(p -> p) + ReLU ------------------------------
        buf[0:planes, M:M + HW] = conv3x3_relu(planes, w2_ref[...], b2_ref[...])

        # ---- stage 3: ConvTranspose2d(p -> p//2, k3, s2, p1, op1) + ReLU --
        # 4-parity decomposition; all four parities from ONE block matmul.
        z00 = buf[0:planes, M:M + HW]                            # z[a    , b    ]
        z01 = buf[0:planes, M + 1:M + 1 + HW] * mask_r           # z[a    , b + 1]
        z10 = buf[0:planes, M + W:M + W + HW]                    # z[a + 1, b    ]
        z11 = buf[0:planes, M + W + 1:M + W + 1 + HW] * mask_r   # z[a + 1, b + 1]
        zbig = jnp.concatenate([z00, z01, z10, z11], axis=0)     # (4*p, HW)
        out = jnp.dot(w3_ref[...], zbig.astype(compute_dtype),
                      preferred_element_type=f32)
        # Single lane-dense, parity-stacked (4*c_out, HW) store.
        o_ref[0] = jnp.maximum(out + b3_ref[...], 0.0)

    return kernel, LBUF


@functools.partial(jax.jit, static_argnames=("planes", "compute_dtype"))
def upsample_block_forward(x_nchw, params, *, planes,
                           compute_dtype=jnp.float32):
    """x_nchw: (N, 2*planes, H, W) -> (N, planes//2, 2H, 2W).

    compute_dtype: matmul-operand dtype (set jnp.bfloat16 on v6e/v7x for 2x
    MXU throughput; accumulation stays f32)."""
    N, c_in, H, W = x_nchw.shape
    assert c_in == 2 * planes
    HW = H * W
    c_out = planes // 2
    f32 = jnp.float32

    x_flat = x_nchw.reshape(N, c_in, HW).astype(f32)   # free reshape, no transpose

    # Column wrap masks, hoisted out of the kernel (resident across grid steps).
    col = jnp.arange(HW, dtype=jnp.int32) % W
    masks = jnp.stack([(col != 0), (col != W - 1)]).astype(f32)     # (2, HW)

    # Conv weights as (Cout, 9*Cin) matrices matching the tap-slab row order
    # (t = 3*ky + kx major, ci minor): w_mat[co, t*Cin + ci] = W[co, ci, ky, kx].
    w1m = jnp.transpose(params["w1"], (0, 2, 3, 1)).reshape(planes, 9 * c_in)
    w2m = jnp.transpose(params["w2"], (0, 2, 3, 1)).reshape(planes, 9 * planes)

    # ConvTranspose block weight: output rows = [p00; p01; p10; p11] parities,
    # K rows = [z00; z01; z10; z11]; d[ka, kb][co, ci] = W_deconv[ci, co, ka, kb].
    d = jnp.transpose(params["w3"], (2, 3, 1, 0))       # (ka, kb, c_out, planes)
    zero = jnp.zeros((c_out, planes), params["w3"].dtype)
    w3big = jnp.concatenate([
        jnp.concatenate([d[1, 1], zero,    zero,    zero   ], axis=1),
        jnp.concatenate([d[1, 2], d[1, 0], zero,    zero   ], axis=1),
        jnp.concatenate([d[2, 1], zero,    d[0, 1], zero   ], axis=1),
        jnp.concatenate([d[2, 2], d[2, 0], d[0, 2], d[0, 0]], axis=1),
    ], axis=0)                                           # (4*c_out, 4*planes)

    w1m = w1m.astype(compute_dtype)
    w2m = w2m.astype(compute_dtype)
    w3big = w3big.astype(compute_dtype)
    b1 = params["b1"].reshape(planes, 1).astype(f32)
    b2 = params["b2"].reshape(planes, 1).astype(f32)
    b3 = jnp.tile(params["b3"].reshape(c_out, 1), (4, 1)).astype(f32)  # (4*c_out,1)

    kernel, LBUF = _make_fused_kernel(H, W, planes, compute_dtype)

    # Rough per-step VMEM working set -> vmem limit (clamped to a sane range).
    elt = jnp.dtype(compute_dtype).itemsize
    act = HW * 4
    vmem_need = (c_in * LBUF * 4                          # halo scratch
                 + 9 * c_in * HW * max(elt, 4)            # biggest tap slab
                 + 2 * c_in * act + 2 * 4 * c_out * act   # dbl-buffered in/out
                 + 2 * (w1m.size + w2m.size + w3big.size) * elt
                 + 8 * planes * act)                      # misc temporaries
    vmem_limit = int(min(100 * 2**20, max(32 * 2**20, 3 * vmem_need)))

    flops = 2 * N * HW * (planes * 9 * c_in + planes * 9 * planes
                          + 4 * c_out * 4 * planes)
    bytes_accessed = 4 * (x_flat.size + masks.size + b1.size + b2.size
                          + b3.size + N * 4 * c_out * HW) \
        + elt * (w1m.size + w2m.size + w3big.size)

    out_ph = pl.pallas_call(
        kernel,
        out_shape=jax.ShapeDtypeStruct((N, 4 * c_out, HW), jnp.float32),
        grid=(N,),
        in_specs=[
            pl.BlockSpec((1, c_in, HW), lambda n: (n, 0, 0)),
            pl.BlockSpec((2, HW), lambda n: (0, 0)),
            pl.BlockSpec((planes, 9 * c_in), lambda n: (0, 0)),
            pl.BlockSpec((planes, 1), lambda n: (0, 0)),
            pl.BlockSpec((planes, 9 * planes), lambda n: (0, 0)),
            pl.BlockSpec((planes, 1), lambda n: (0, 0)),
            pl.BlockSpec((4 * c_out, 4 * planes), lambda n: (0, 0)),
            pl.BlockSpec((4 * c_out, 1), lambda n: (0, 0)),
        ],
        out_specs=pl.BlockSpec((1, 4 * c_out, HW), lambda n: (n, 0, 0)),
        scratch_shapes=[pltpu.VMEM((c_in, LBUF), jnp.float32)],
        compiler_params=pltpu.CompilerParams(
            dimension_semantics=("parallel",),
            vmem_limit_bytes=vmem_limit),
        cost_estimate=pl.CostEstimate(flops=flops, transcendentals=0,
                                      bytes_accessed=int(bytes_accessed)),
    )(x_flat, masks, w1m, b1, w2m, b2, w3big, b3)

    # Single cheap layout fix-up: interleave the four parities into NCHW.
    out = out_ph.reshape(N, 2, 2, c_out, H, W)
    out = jnp.transpose(out, (0, 3, 4, 1, 5, 2))         # (N, c_out, H, 2, W, 2)
    return out.reshape(N, c_out, 2 * H, 2 * W)


def init_params(planes, key):
    """Deterministic synthetic parameters in the PyTorch layouts.
    Conv2d weight: (Cout, Cin, kh, kw); ConvTranspose2d weight: (Cin, Cout, kh, kw)."""
    k1, k2, k3, k4, k5, k6 = jax.random.split(key, 6)
    return dict(
        w1=jax.random.normal(k1, (planes, 2 * planes, 3, 3), jnp.float32) * 0.1,
        b1=jax.random.normal(k2, (planes,), jnp.float32) * 0.1,
        w2=jax.random.normal(k3, (planes, planes, 3, 3), jnp.float32) * 0.1,
        b2=jax.random.normal(k4, (planes,), jnp.float32) * 0.1,
        w3=jax.random.normal(k5, (planes, planes // 2, 3, 3), jnp.float32) * 0.1,
        b3=jax.random.normal(k6, (planes // 2,), jnp.float32) * 0.1,
    )


def _reference_forward(x, params):
    """Pure-lax NCHW reference (PyTorch semantics) for correctness checking."""
    dn = ("NCHW", "OIHW", "NCHW")
    y = lax.conv_general_dilated(x, params["w1"], (1, 1), ((1, 1), (1, 1)),
                                 dimension_numbers=dn)
    y = jnp.maximum(y + params["b1"][None, :, None, None], 0.0)
    z = lax.conv_general_dilated(y, params["w2"], (1, 1), ((1, 1), (1, 1)),
                                 dimension_numbers=dn)
    z = jnp.maximum(z + params["b2"][None, :, None, None], 0.0)
    # ConvTranspose2d(k=3, s=2, p=1, op=1) == dilated conv with flipped,
    # channel-swapped kernel and (1, 2) asymmetric padding.
    w3e = jnp.transpose(params["w3"], (1, 0, 2, 3))[:, :, ::-1, ::-1]
    o = lax.conv_general_dilated(z, w3e, (1, 1), ((1, 2), (1, 2)),
                                 lhs_dilation=(2, 2), dimension_numbers=dn)
    return jnp.maximum(o + params["b3"][None, :, None, None], 0.0)


if __name__ == "__main__":
    planes = 4
    N, H, W = 2, 16, 16
    key = jax.random.PRNGKey(0)
    kx, kp = jax.random.split(key)

    x = jax.random.normal(kx, (N, 2 * planes, H, W), jnp.float32)   # NCHW input
    params = init_params(planes, kp)

    out = jax.block_until_ready(upsample_block_forward(x, params, planes=planes))
    assert out.shape == (N, planes // 2, 2 * H, 2 * W), out.shape

    ref = jax.block_until_ready(_reference_forward(x, params))
    max_err = float(jnp.max(jnp.abs(out - ref)))
    assert jnp.allclose(out, ref, atol=1e-3, rtol=1e-3), f"mismatch, max_err={max_err}"

    print("KERNEL_OK")
</pallas_src>

<mosaic_0001>
module attributes {stable_mosaic.version = 11 : i64} {
  func.func @kernel(%arg0: i32, %arg1: memref<1x8x256xf32, #tpu.memory_space<vmem>>, %arg2: memref<2x256xf32, #tpu.memory_space<vmem>>, %arg3: memref<4x72xf32, #tpu.memory_space<vmem>>, %arg4: memref<4x1xf32, #tpu.memory_space<vmem>>, %arg5: memref<4x36xf32, #tpu.memory_space<vmem>>, %arg6: memref<4x1xf32, #tpu.memory_space<vmem>>, %arg7: memref<8x16xf32, #tpu.memory_space<vmem>>, %arg8: memref<8x1xf32, #tpu.memory_space<vmem>>, %arg9: memref<1x8x256xf32, #tpu.memory_space<vmem>>, %arg10: memref<8x290xf32, #tpu.memory_space<vmem>>) attributes {dimension_semantics = [#tpu.dimension_semantics<parallel>], iteration_bounds = array<i64: 2>, scalar_prefetch = 0 : i64, scratch_operands = 1 : i64, tpu.core_type = #tpu.core_type<tc>, window_params = [{transform_indices = @transform_0, window_bounds = array<i64: 1, 8, 256>}, {pipeline_mode = #tpu.pipeline_mode<synchronous>, transform_indices = @transform_1, window_bounds = array<i64: 2, 256>}, {pipeline_mode = #tpu.pipeline_mode<synchronous>, transform_indices = @transform_2, window_bounds = array<i64: 4, 72>}, {pipeline_mode = #tpu.pipeline_mode<synchronous>, transform_indices = @transform_3, window_bounds = array<i64: 4, 1>}, {pipeline_mode = #tpu.pipeline_mode<synchronous>, transform_indices = @transform_4, window_bounds = array<i64: 4, 36>}, {pipeline_mode = #tpu.pipeline_mode<synchronous>, transform_indices = @transform_5, window_bounds = array<i64: 4, 1>}, {pipeline_mode = #tpu.pipeline_mode<synchronous>, transform_indices = @transform_6, window_bounds = array<i64: 8, 16>}, {pipeline_mode = #tpu.pipeline_mode<synchronous>, transform_indices = @transform_7, window_bounds = array<i64: 8, 1>}, {transform_indices = @transform_8, window_bounds = array<i64: 1, 8, 256>}]} {
    %c0 = arith.constant 0 : index
    %c0_0 = arith.constant 0 : index
    %0 = vector.load %arg2[%c0, %c0_0] : memref<2x256xf32, #tpu.memory_space<vmem>>, vector<1x256xf32>
    %c1 = arith.constant 1 : index
    %c0_1 = arith.constant 0 : index
    %1 = vector.load %arg2[%c1, %c0_1] : memref<2x256xf32, #tpu.memory_space<vmem>>, vector<1x256xf32>
    %cst = arith.constant 0.000000e+00 : f32
    %2 = vector.broadcast %cst : f32 to vector<8x17xf32>
    %c0_2 = arith.constant 0 : index
    %c0_3 = arith.constant 0 : index
    %3 = vector.load %arg10[%c0_2, %c0_3] : memref<8x290xf32, #tpu.memory_space<vmem>>, vector<8x17xf32>
    tpu.vector_store %arg10[%c0_2, %c0_3], %2 {strides = array<i32>} : memref<8x290xf32, #tpu.memory_space<vmem>>, vector<8x17xf32>,
    %cst_4 = arith.constant 0.000000e+00 : f32
    %4 = vector.broadcast %cst_4 : f32 to vector<8x17xf32>
    %c0_5 = arith.constant 0 : index
    %c273 = arith.constant 273 : index
    %5 = vector.load %arg10[%c0_5, %c273] : memref<8x290xf32, #tpu.memory_space<vmem>>, vector<8x17xf32>
    tpu.vector_store %arg10[%c0_5, %c273], %4 {strides = array<i32>} : memref<8x290xf32, #tpu.memory_space<vmem>>, vector<8x17xf32>,
    %c0_6 = arith.constant 0 : index
    %c0_7 = arith.constant 0 : index
    %c0_8 = arith.constant 0 : index
    %6 = vector.load %arg1[%c0_6, %c0_7, %c0_8] : memref<1x8x256xf32, #tpu.memory_space<vmem>>, vector<1x8x256xf32>
    %7 = vector.shape_cast %6 : vector<1x8x256xf32> to vector<8x256xf32>
    %c0_9 = arith.constant 0 : index
    %c17 = arith.constant 17 : index
    %8 = vector.load %arg10[%c0_9, %c17] : memref<8x290xf32, #tpu.memory_space<vmem>>, vector<8x256xf32>
    tpu.vector_store %arg10[%c0_9, %c17], %7 {strides = array<i32>} : memref<8x290xf32, #tpu.memory_space<vmem>>, vector<8x256xf32>,
    %c0_10 = arith.constant 0 : index
    %c0_11 = arith.constant 0 : index
    %9 = vector.load %arg3[%c0_10, %c0_11] : memref<4x72xf32, #tpu.memory_space<vmem>>, vector<4x72xf32>
    %c0_12 = arith.constant 0 : index
    %c0_13 = arith.constant 0 : index
    %10 = vector.load %arg4[%c0_12, %c0_13] : memref<4x1xf32, #tpu.memory_space<vmem>>, vector<4x1xf32>
    %c0_14 = arith.constant 0 : index
    %c0_15 = arith.constant 0 : index
    %11 = vector.load %arg10[%c0_14, %c0_15] : memref<8x290xf32, #tpu.memory_space<vmem>>, vector<8x256xf32>
    %12 = vector.broadcast %0 : vector<1x256xf32> to vector<8x256xf32>
    %13 = arith.mulf %11, %12 : vector<8x256xf32>
    %c0_16 = arith.constant 0 : index
    %c1_17 = arith.constant 1 : index
    %14 = vector.load %arg10[%c0_16, %c1_17] : memref<8x290xf32, #tpu.memory_space<vmem>>, vector<8x256xf32>
    %c0_18 = arith.constant 0 : index
    %c2 = arith.constant 2 : index
    %15 = vector.load %arg10[%c0_18, %c2] : memref<8x290xf32, #tpu.memory_space<vmem>>, vector<8x256xf32>
    %16 = vector.broadcast %1 : vector<1x256xf32> to vector<8x256xf32>
    %17 = arith.mulf %15, %16 : vector<8x256xf32>
    %c0_19 = arith.constant 0 : index
    %c16 = arith.constant 16 : index
    %18 = vector.load %arg10[%c0_19, %c16] : memref<8x290xf32, #tpu.memory_space<vmem>>, vector<8x256xf32>
    %19 = vector.broadcast %0 : vector<1x256xf32> to vector<8x256xf32>
    %20 = arith.mulf %18, %19 : vector<8x256xf32>
    %c0_20 = arith.constant 0 : index
    %c17_21 = arith.constant 17 : index
    %21 = vector.load %arg10[%c0_20, %c17_21] : memref<8x290xf32, #tpu.memory_space<vmem>>, vector<8x256xf32>
    %c0_22 = arith.constant 0 : index
    %c18 = arith.constant 18 : index
    %22 = vector.load %arg10[%c0_22, %c18] : memref<8x290xf32, #tpu.memory_space<vmem>>, vector<8x256xf32>
    %23 = vector.broadcast %1 : vector<1x256xf32> to vector<8x256xf32>
    %24 = arith.mulf %22, %23 : vector<8x256xf32>
    %c0_23 = arith.constant 0 : index
    %c32 = arith.constant 32 : index
    %25 = vector.load %arg10[%c0_23, %c32] : memref<8x290xf32, #tpu.memory_space<vmem>>, vector<8x256xf32>
    %26 = vector.broadcast %0 : vector<1x256xf32> to vector<8x256xf32>
    %27 = arith.mulf %25, %26 : vector<8x256xf32>
    %c0_24 = arith.constant 0 : index
    %c33 = arith.constant 33 : index
    %28 = vector.load %arg10[%c0_24, %c33] : memref<8x290xf32, #tpu.memory_space<vmem>>, vector<8x256xf32>
    %c0_25 = arith.constant 0 : index
    %c34 = arith.constant 34 : index
    %29 = vector.load %arg10[%c0_25, %c34] : memref<8x290xf32, #tpu.memory_space<vmem>>, vector<8x256xf32>
    %30 = vector.broadcast %1 : vector<1x256xf32> to vector<8x256xf32>
    %31 = arith.mulf %29, %30 : vector<8x256xf32>
    %32 = tpu.concatenate %13, %14, %17, %20, %21, %24, %27, %28, %31 in 0 : vector<8x256xf32>, vector<8x256xf32>, vector<8x256xf32>, vector<8x256xf32>, vector<8x256xf32>, vector<8x256xf32>, vector<8x256xf32>, vector<8x256xf32>, vector<8x256xf32> -> vector<72x256xf32>
    %cst_26 = arith.constant dense<0.000000e+00> : vector<4x256xf32>
    %33 = tpu.matmul %9, %32, %cst_26 {dimension_numbers = #tpu.dot_dimension_numbers<[1], [0], [0], [1], [0, 0, 1, 1], [], []>} : vector<4x72xf32>, vector<72x256xf32>, vector<4x256xf32> -> vector<4x256xf32>
    %34 = vector.broadcast %10 : vector<4x1xf32> to vector<4x256xf32>
    %35 = arith.addf %33, %34 : vector<4x256xf32>
    %cst_27 = arith.constant 0.000000e+00 : f32
    %36 = vector.broadcast %cst_27 : f32 to vector<4x256xf32>
    %37 = arith.maximumf %35, %36 : vector<4x256xf32>
    %c0_28 = arith.constant 0 : index
    %c17_29 = arith.constant 17 : index
    %38 = vector.load %arg10[%c0_28, %c17_29] : memref<8x290xf32, #tpu.memory_space<vmem>>, vector<4x256xf32>
    tpu.vector_store %arg10[%c0_28, %c17_29], %37 {strides = array<i32>} : memref<8x290xf32, #tpu.memory_space<vmem>>, vector<4x256xf32>,
    %c0_30 = arith.constant 0 : index
    %c0_31 = arith.constant 0 : index
    %39 = vector.load %arg5[%c0_30, %c0_31] : memref<4x36xf32, #tpu.memory_space<vmem>>, vector<4x36xf32>
    %c0_32 = arith.constant 0 : index
    %c0_33 = arith.constant 0 : index
    %40 = vector.load %arg6[%c0_32, %c0_33] : memref<4x1xf32, #tpu.memory_space<vmem>>, vector<4x1xf32>
    %c0_34 = arith.constant 0 : index
    %c0_35 = arith.constant 0 : index
    %41 = vector.load %arg10[%c0_34, %c0_35] : memref<8x290xf32, #tpu.memory_space<vmem>>, vector<4x256xf32>
    %42 = vector.broadcast %0 : vector<1x256xf32> to vector<4x256xf32>
    %43 = arith.mulf %41, %42 : vector<4x256xf32>
    %c0_36 = arith.constant 0 : index
    %c1_37 = arith.constant 1 : index
    %44 = vector.load %arg10[%c0_36, %c1_37] : memref<8x290xf32, #tpu.memory_space<vmem>>, vector<4x256xf32>
    %c0_38 = arith.constant 0 : index
    %c2_39 = arith.constant 2 : index
    %45 = vector.load %arg10[%c0_38, %c2_39] : memref<8x290xf32, #tpu.memory_space<vmem>>, vector<4x256xf32>
    %46 = vector.broadcast %1 : vector<1x256xf32> to vector<4x256xf32>
    %47 = arith.mulf %45, %46 : vector<4x256xf32>
    %c0_40 = arith.constant 0 : index
    %c16_41 = arith.constant 16 : index
    %48 = vector.load %arg10[%c0_40, %c16_41] : memref<8x290xf32, #tpu.memory_space<vmem>>, vector<4x256xf32>
    %49 = vector.broadcast %0 : vector<1x256xf32> to vector<4x256xf32>
    %50 = arith.mulf %48, %49 : vector<4x256xf32>
    %c0_42 = arith.constant 0 : index
    %c17_43 = arith.constant 17 : index
    %51 = vector.load %arg10[%c0_42, %c17_43] : memref<8x290xf32, #tpu.memory_space<vmem>>, vector<4x256xf32>
    %c0_44 = arith.constant 0 : index
    %c18_45 = arith.constant 18 : index
    %52 = vector.load %arg10[%c0_44, %c18_45] : memref<8x290xf32, #tpu.memory_space<vmem>>, vector<4x256xf32>
    %53 = vector.broadcast %1 : vector<1x256xf32> to vector<4x256xf32>
    %54 = arith.mulf %52, %53 : vector<4x256xf32>
    %c0_46 = arith.constant 0 : index
    %c32_47 = arith.constant 32 : index
    %55 = vector.load %arg10[%c0_46, %c32_47] : memref<8x290xf32, #tpu.memory_space<vmem>>, vector<4x256xf32>
    %56 = vector.broadcast %0 : vector<1x256xf32> to vector<4x256xf32>
    %57 = arith.mulf %55, %56 : vector<4x256xf32>
    %c0_48 = arith.constant 0 : index
    %c33_49 = arith.constant 33 : index
    %58 = vector.load %arg10[%c0_48, %c33_49] : memref<8x290xf32, #tpu.memory_space<vmem>>, vector<4x256xf32>
    %c0_50 = arith.constant 0 : index
    %c34_51 = arith.constant 34 : index
    %59 = vector.load %arg10[%c0_50, %c34_51] : memref<8x290xf32, #tpu.memory_space<vmem>>, vector<4x256xf32>
    %60 = vector.broadcast %1 : vector<1x256xf32> to vector<4x256xf32>
    %61 = arith.mulf %59, %60 : vector<4x256xf32>
    %62 = tpu.concatenate %43, %44, %47, %50, %51, %54, %57, %58, %61 in 0 : vector<4x256xf32>, vector<4x256xf32>, vector<4x256xf32>, vector<4x256xf32>, vector<4x256xf32>, vector<4x256xf32>, vector<4x256xf32>, vector<4x256xf32>, vector<4x256xf32> -> vector<36x256xf32>
    %cst_52 = arith.constant dense<0.000000e+00> : vector<4x256xf32>
    %63 = tpu.matmul %39, %62, %cst_52 {dimension_numbers = #tpu.dot_dimension_numbers<[1], [0], [0], [1], [0, 0, 1, 1], [], []>} : vector<4x36xf32>, vector<36x256xf32>, vector<4x256xf32> -> vector<4x256xf32>
    %64 = vector.broadcast %40 : vector<4x1xf32> to vector<4x256xf32>
    %65 = arith.addf %63, %64 : vector<4x256xf32>
    %cst_53 = arith.constant 0.000000e+00 : f32
    %66 = vector.broadcast %cst_53 : f32 to vector<4x256xf32>
    %67 = arith.maximumf %65, %66 : vector<4x256xf32>
    %c0_54 = arith.constant 0 : index
    %c17_55 = arith.constant 17 : index
    %68 = vector.load %arg10[%c0_54, %c17_55] : memref<8x290xf32, #tpu.memory_space<vmem>>, vector<4x256xf32>
    tpu.vector_store %arg10[%c0_54, %c17_55], %67 {strides = array<i32>} : memref<8x290xf32, #tpu.memory_space<vmem>>, vector<4x256xf32>,
    %c0_56 = arith.constant 0 : index
    %c17_57 = arith.constant 17 : index
    %69 = vector.load %arg10[%c0_56, %c17_57] : memref<8x290xf32, #tpu.memory_space<vmem>>, vector<4x256xf32>
    %c0_58 = arith.constant 0 : index
    %c18_59 = arith.constant 18 : index
    %70 = vector.load %arg10[%c0_58, %c18_59] : memref<8x290xf32, #tpu.memory_space<vmem>>, vector<4x256xf32>
    %71 = vector.broadcast %1 : vector<1x256xf32> to vector<4x256xf32>
    %72 = arith.mulf %70, %71 : vector<4x256xf32>
    %c0_60 = arith.constant 0 : index
    %c33_61 = arith.constant 33 : index
    %73 = vector.load %arg10[%c0_60, %c33_61] : memref<8x290xf32, #tpu.memory_space<vmem>>, vector<4x256xf32>
    %c0_62 = arith.constant 0 : index
    %c34_63 = arith.constant 34 : index
    %74 = vector.load %arg10[%c0_62, %c34_63] : memref<8x290xf32, #tpu.memory_space<vmem>>, vector<4x256xf32>
    %75 = vector.broadcast %1 : vector<1x256xf32> to vector<4x256xf32>
    %76 = arith.mulf %74, %75 : vector<4x256xf32>
    %77 = tpu.concatenate %69, %72, %73, %76 in 0 : vector<4x256xf32>, vector<4x256xf32>, vector<4x256xf32>, vector<4x256xf32> -> vector<16x256xf32>
    %c0_64 = arith.constant 0 : index
    %c0_65 = arith.constant 0 : index
    %78 = vector.load %arg7[%c0_64, %c0_65] : memref<8x16xf32, #tpu.memory_space<vmem>>, vector<8x16xf32>
    %cst_66 = arith.constant dense<0.000000e+00> : vector<8x256xf32>
    %79 = tpu.matmul %78, %77, %cst_66 {dimension_numbers = #tpu.dot_dimension_numbers<[1], [0], [0], [1], [0, 0, 1, 1], [], []>} : vector<8x16xf32>, vector<16x256xf32>, vector<8x256xf32> -> vector<8x256xf32>
    %c0_67 = arith.constant 0 : index
    %c0_68 = arith.constant 0 : index
    %80 = vector.load %arg8[%c0_67, %c0_68] : memref<8x1xf32, #tpu.memory_space<vmem>>, vector<8x1xf32>
    %81 = vector.broadcast %80 : vector<8x1xf32> to vector<8x256xf32>
    %82 = arith.addf %79, %81 : vector<8x256xf32>
    %cst_69 = arith.constant 0.000000e+00 : f32
    %83 = vector.broadcast %cst_69 : f32 to vector<8x256xf32>
    %84 = arith.maximumf %82, %83 : vector<8x256xf32>
    %c0_70 = arith.constant 0 : index
    %c0_71 = arith.constant 0 : index
    %c0_72 = arith.constant 0 : index
    %85 = vector.load %arg9[%c0_70, %c0_71, %c0_72] : memref<1x8x256xf32, #tpu.memory_space<vmem>>, vector<1x8x256xf32>
    %86 = vector.shape_cast %85 : vector<1x8x256xf32> to vector<8x256xf32>
    %87 = vector.shape_cast %84 : vector<8x256xf32> to vector<1x8x256xf32>
    tpu.vector_store %arg9[%c0_70, %c0_71, %c0_72], %87 {strides = array<i32>} : memref<1x8x256xf32, #tpu.memory_space<vmem>>, vector<1x8x256xf32>,
    return
  }
  func.func @transform_0(%arg0: i32) -> (i32, i32, i32) {
    %c0_i32 = arith.constant 0 : i32
    %c0_i32_0 = arith.constant 0 : i32
    %c0_i32_1 = arith.constant 0 : i32
    return %arg0, %c0_i32, %c0_i32_0 : i32, i32, i32
  }
  func.func @transform_1(%arg0: i32) -> (i32, i32) {
    %c0_i32 = arith.constant 0 : i32
    %c0_i32_0 = arith.constant 0 : i32
    %c0_i32_1 = arith.constant 0 : i32
    return %c0_i32, %c0_i32_0 : i32, i32
  }
  func.func @transform_2(%arg0: i32) -> (i32, i32) {
    %c0_i32 = arith.constant 0 : i32
    %c0_i32_0 = arith.constant 0 : i32
    %c0_i32_1 = arith.constant 0 : i32
    return %c0_i32, %c0_i32_0 : i32, i32
  }
  func.func @transform_3(%arg0: i32) -> (i32, i32) {
    %c0_i32 = arith.constant 0 : i32
    %c0_i32_0 = arith.constant 0 : i32
    %c0_i32_1 = arith.constant 0 : i32
    return %c0_i32, %c0_i32_0 : i32, i32
  }
  func.func @transform_4(%arg0: i32) -> (i32, i32) {
    %c0_i32 = arith.constant 0 : i32
    %c0_i32_0 = arith.constant 0 : i32
    %c0_i32_1 = arith.constant 0 : i32
    return %c0_i32, %c0_i32_0 : i32, i32
  }
  func.func @transform_5(%arg0: i32) -> (i32, i32) {
    %c0_i32 = arith.constant 0 : i32
    %c0_i32_0 = arith.constant 0 : i32
    %c0_i32_1 = arith.constant 0 : i32
    return %c0_i32, %c0_i32_0 : i32, i32
  }
  func.func @transform_6(%arg0: i32) -> (i32, i32) {
    %c0_i32 = arith.constant 0 : i32
    %c0_i32_0 = arith.constant 0 : i32
    %c0_i32_1 = arith.constant 0 : i32
    return %c0_i32, %c0_i32_0 : i32, i32
  }
  func.func @transform_7(%arg0: i32) -> (i32, i32) {
    %c0_i32 = arith.constant 0 : i32
    %c0_i32_0 = arith.constant 0 : i32
    %c0_i32_1 = arith.constant 0 : i32
    return %c0_i32, %c0_i32_0 : i32, i32
  }
  func.func @transform_8(%arg0: i32) -> (i32, i32, i32) {
    %c0_i32 = arith.constant 0 : i32
    %c0_i32_0 = arith.constant 0 : i32
    %c0_i32_1 = arith.constant 0 : i32
    return %arg0, %c0_i32, %c0_i32_0 : i32, i32, i32
  }
}

</mosaic_0001>

<bundles_post_ra>
// kernel: upsample_block_forward.1
= control target key start
LH: loop header
LB: loop body
LE: loop exit
PB: predicated region body
PF: predicated region fallthrough
CT: control target
= control target key end

     0   :  { %s1196_s27 = smov 0   ;;  %s1528_s0 = inlined_call_operand.vmem [shape: f32[2,8,256], index: 0, kind: input, shape index: {}]   ;;  %s1529_s1 = inlined_call_operand.vmem [shape: f32[2,256], index: 1, kind: input, shape index: {}]   ;;  %s1530_s2 = inlined_call_operand.vmem [shape: f32[4,72], index: 2, kind: input, shape index: {}]   ;;  %s1531_s3 = inlined_call_operand.vmem [shape: f32[4,1], index: 3, kind: input, shape index: {}]   ;;  %s1532_s4 = inlined_call_operand.vmem [shape: f32[4,36], index: 4, kind: input, shape index: {}]   ;;  %s1533_s5 = inlined_call_operand.vmem [shape: f32[4,1], index: 5, kind: input, shape index: {}]   ;;  %s1534_s6 = inlined_call_operand.vmem [shape: f32[8,16], index: 6, kind: input, shape index: {}]   ;;  %s1535_s7 = inlined_call_operand.vmem [shape: f32[8,1], index: 7, kind: input, shape index: {}]   ;;  %s1536_s8 = inlined_call_operand.vmem [shape: f32[2,8,256], index: 8, kind: output, shape index: {}]  }
   0x1 LB: > { %s1083_s28 = sadd.s32 4294967295, %s1133_s27   ;;  %p1087_p0 = scmp.ge.s32.totalorder %s1133_s27, 1  ;;  %s1133_s27 = sphi %s1196_s27, %s18_s27  }
   0x2   : > { %p262_p1 = scmp.lt.s32.totalorder %s1133_s27, 3 }
   0x4   : > { %p263_p2 = pnand %p1087_p0, %p262_p1 }
   0x5   : > { %p296_p3 = scmp.lt.s32.totalorder (!%p263_p2), %s1083_s28, 1  ;;  %s1136_s13 = smov (!%p263_p2), 17  }
   0x6   : > { %266 = sbr.rel (%p263_p2) target bundleno = 1564 (0x61c), region = 52  ;;  %s1137_s14 = smov (!%p263_p2), 34  }
   0x7   : > { %s1138_s17 = smov (!%p263_p2), 32   ;;  %s1139_s18 = smov (!%p263_p2), 18  }
   0x8   : > { %s1140_s19 = smov (!%p263_p2), 16   ;;  %s1141_s20 = smov (!%p263_p2), 2  }
   0x9   : > { %s1142_s21 = smov (!%p263_p2), 95   ;;  %s1143_s22 = smov (!%p263_p2), 111  }
   0xa   : > { %s1144_s23 = smov (!%p263_p2), 94   ;;  %s1145_s24 = smov (!%p263_p2), 96  }
   0xb   : > { %v334_v0 = vlaneseq  ;;  %vm309_vm0 = vcmask 138240   ;;  %s1538_s28 = smov (!%p296_p3, %s1083_s28), 1  ;;  %v1135_v2 = vmov 0.0   ;;  %vm311_vm1 = vcmask 277640   ;;  %s1146_s25 = smov 110  }
   0xc   : > { %310 = vst.msk [vmem:[#allocation2] sm:$0xff] %vm309_vm0, %v1135_v2  ;;  %595 = vmatprep.mubr.f32.mxu0 %v1135_v2  ;;  %832 = vmatprep.mubr.f32.mxu1 %v1135_v2  ;;  %v1092_v3 = vld [vmem:[%s1529_s1 + $0x1] ss:$2 sm:$0x3]  ;;  %s1100_s9 = sshll.u32 %s1538_s28, 4  ;;  %vm325_vm2 = vcmask 1047688  }
   0xd   : > { %v335_v1 = vshrl.u32 %v334_v0, 7  ;;  %312 = vst.msk [vmem:[#allocation2 + $0x10] sm:$0xff] %vm311_vm1, %v1135_v2  ;;  %s300_s12 = scalar_lea.vmem %s1528_s0, %s1100_s9  ;;  %v306_v10 = vld [vmem:[%s1529_s1] ss:$2 sm:$0x3]  ;;  %vm408_vm3 = vcmask 277504  }
   0xe   : > { %v313_v6 = vld [vmem:[%s300_s12] sm:$0xff]  ;;  %v314_v8 = vld [vmem:[%s300_s12 + $0x8] sm:$0xff]  ;;  %vm384_vm4 = vcmask 146432   ;;  %s1147_s26 = smov 112   ;;  %vm396_vm5 = vcmask 261120   ;;  %vm372_vm6 = vcmask 130048  }
   0xf   : > { %v336_v4 = vsub.s32 0, %v335_v1  ;;  %v340_v5 = vsub.s32 1, %v335_v1  ;;  %317 = vrot.lane.b32.xlu0 %v313_v6, %s1136_s13  ;;  %s1148_s29 = smov 126   ;;  %vm360_vm7 = vcmask 15360   ;;  %s1149_s30 = smov 127   ;;  %v1150_v47 = vmov 0  }
  0x10   : > { %1126 = vset.pattern.permute.xlu0 %v1150_v47  ;;  %v330_v49 = vld [vmem:[%s1531_s3] sm:$0xf]  ;;  %vm517_vm8 = vcmask 769024   ;;  %vm503_vm9 = vcmask 777216   ;;  %vm492_vm10 = vcmask 785408   ;;  %vm478_vm11 = vcmask 900096  }
  0x11   : > { %v351_v7 = vrot.slane %v1092_v3, %v336_v4  ;;  %v355_v9 = vrot.slane %v1092_v3, %v340_v5  ;;  %v1225_v11 = vrot.slane %v306_v10, %v336_v4  ;;  %v1227_v12 = vrot.slane %v306_v10, %v340_v5 }
  0x12   : > { %vm464_vm12 = vcmask 908288   ;;  %vm453_vm13 = vcmask 916480   ;;  %vm439_vm14 = vcmask 1031168   ;;  %vm425_vm15 = vcmask 1039360  }
  0x13   : > { %404 = vrot.lane.b32.xlu1 %v351_v7, %s1137_s14  ;;  %319 = vrot.lane.b32.xlu0 %v314_v8, %s1136_s13  ;;  %vm527_vm1 = vcmask 588800  }
  0x17   : > { %406 = vrot.lane.b32.xlu1 %v355_v9, %s1137_s14  ;;  %392 = vrot.lane.b32.xlu0 %v1225_v11, %s1138_s17 }
  0x1b   : > { %394 = vrot.lane.b32.xlu1 %v1227_v12, %s1138_s17  ;;  %380 = vrot.lane.b32.xlu0 %v351_v7, %s1139_s18 }
  0x1f   : > { %382 = vrot.lane.b32.xlu1 %v355_v9, %s1139_s18  ;;  %368 = vrot.lane.b32.xlu0 %v1225_v11, %s1140_s19 }
  0x23   : > { %370 = vrot.lane.b32.xlu1 %v1227_v12, %s1140_s19  ;;  %356 = vrot.lane.b32.xlu0 %v351_v7, %s1141_s20 }
  0x27   : > { %358 = vrot.lane.b32.xlu1 %v355_v9, %s1141_s20 }
  0x81   : > { %v318_v13 = vpop.permute.xlu0 %317 }
  0x82   : > { %326 = vst.msk [vmem:[#allocation2] sm:$0xff] %vm325_vm2, %v318_v13  ;;  %vm614_vm2 = vcmask 1043592  }
  0x85   : > { %v1233_v14 = vpop.permute.xlu1 %404  ;;  %v320_v15 = vpop.permute.xlu0 %319 }
  0x86   : > { %v1236_v16 = vsel %vm309_vm0, %v318_v13, %v320_v15  ;;  %328 = vst.msk [vmem:[#allocation2 + $0x10] sm:$0xff] %vm309_vm0, %v320_v15 }
  0x87   : > { %327 = vst [vmem:[#allocation2 + $0x8] sm:$0xff] %v1236_v16 }
  0x89   : > { %v1240_v17 = vpop.permute.xlu1 %406  ;;  %v1242_v18 = vld [vmem:[#allocation2] sm:$0xff]  ;;  %v1254_v21 = vpop.permute.xlu0 %392 }
  0x8a   : > { %497 = vrot.lane.b32.xlu1 %v1242_v18, %s1142_s21  ;;  %v413_v26 = vmul.f32 %v1233_v14, %v1242_v18  ;;  %v401_v28 = vmul.f32 %v1254_v21, %v1242_v18  ;;  %v1299_v36 = vsel %vm408_vm3, %v1233_v14, %v1240_v17  ;;  %v344_v47 = vmul.f32 %v1225_v11, %v1242_v18 }
  0x8b   : > { %v414_v38 = vmul.f32 %v1299_v36, %v1236_v16  ;;  %vm617_vm3 = vcmask 134144  }
  0x8d   : > { %v1246_v19 = vld [vmem:[#allocation2 + $0x10] sm:$0xff]  ;;  %v1252_v20 = vpop.permute.xlu1 %394  ;;  %v1267_v24 = vpop.permute.xlu0 %380 }
  0x8e   : > { %462 = vrot.lane.b32.xlu1 %v1246_v19, %s1143_s22  ;;  %501 = vrot.lane.b32.xlu0 %v1246_v19, %s1142_s21  ;;  %v415_v22 = vmul.f32 %v1240_v17, %v1246_v19  ;;  %v403_v25 = vmul.f32 %v1252_v20, %v1246_v19  ;;  %v389_v29 = vmul.f32 %v1267_v24, %v1242_v18 }
  0x8f   : > { %v1313_v40 = vsel %vm396_vm5, %v1254_v21, %v1252_v20  ;;  %vm760_vm5 = vcmask 293888  }
  0x90   : > { %v402_v42 = vmul.f32 %v1313_v40, %v1236_v16 }
  0x91   : > { %v1262_v23 = vpop.permute.xlu1 %382  ;;  %v1281_v30 = vpop.permute.xlu0 %368 }
  0x92   : > { %458 = vrot.lane.b32.xlu0 %v1242_v18, %s1143_s22  ;;  %499 = vrot.lane.b32.xlu1 %v1236_v16, %s1142_s21  ;;  %v377_v31 = vmul.f32 %v1281_v30, %v1242_v18  ;;  %v391_v32 = vmul.f32 %v1262_v23, %v1246_v19  ;;  %v1303_v37 = vsel %vm384_vm4, %v1267_v24, %v1262_v23  ;;  %vm746_vm4 = vcmask 1043456  }
  0x93   : > { %v390_v39 = vmul.f32 %v1303_v37, %v1236_v16 }
  0x95   : > { %v1275_v27 = vpop.permute.xlu1 %370  ;;  %v1326_v44 = vpop.permute.xlu0 %356 }
  0x96   : > { %460 = vrot.lane.b32.xlu0 %v1236_v16, %s1143_s22  ;;  %515 = vrot.lane.b32.xlu1 %v415_v22, %s1144_s23  ;;  %v379_v34 = vmul.f32 %v1275_v27, %v1246_v19  ;;  %v1318_v41 = vsel %vm372_vm6, %v1281_v30, %v1275_v27  ;;  %v365_v45 = vmul.f32 %v1326_v44, %v1242_v18 }
  0x97   : > { %v378_v43 = vmul.f32 %v1318_v41, %v1236_v16 }
  0x99   : > { %v1289_v33 = vpop.permute.xlu1 %358 }
  0x9a   : > { %511 = vrot.lane.b32.xlu0 %v413_v26, %s1144_s23  ;;  %490 = vrot.lane.b32.xlu1 %v403_v25, %s1145_s24  ;;  %v367_v35 = vmul.f32 %v1289_v33, %v1246_v19  ;;  %v1334_v46 = vsel %vm360_vm7, %v1326_v44, %v1289_v33 }
  0x9b   : > { %v366_v48 = vmul.f32 %v1334_v46, %v1236_v16 }
  0x9e   : > { %486 = vrot.lane.b32.xlu0 %v401_v28, %s1145_s24  ;;  %472 = vrot.lane.b32.xlu1 %v389_v29, %s1146_s25 }
  0xa2   : > { %476 = vrot.lane.b32.xlu0 %v391_v32, %s1146_s25  ;;  %447 = vrot.lane.b32.xlu1 %v377_v31, %s1147_s26 }
  0xa6   : > { %451 = vrot.lane.b32.xlu0 %v379_v34, %s1147_s26  ;;  %437 = vrot.lane.b32.xlu1 %v367_v35, %s1148_s29 }
  0xaa   : > { %513 = vrot.lane.b32.xlu0 %v414_v38, %s1144_s23  ;;  %474 = vrot.lane.b32.xlu1 %v390_v39, %s1146_s25 }
  0xae   : > { %488 = vrot.lane.b32.xlu0 %v402_v42, %s1145_s24  ;;  %449 = vrot.lane.b32.xlu1 %v378_v43, %s1147_s26 }
  0xb2   : > { %421 = vrot.lane.b32.xlu1 %v1236_v16, %s1149_s30  ;;  %433 = vrot.lane.b32.xlu0 %v365_v45, %s1148_s29  ;;  %v345_v45 = vmul.f32 %v1227_v12, %v1236_v16 }
  0xb6   : > { %419 = vrot.lane.b32.xlu1 %v1242_v18, %s1149_s30  ;;  %435 = vrot.lane.b32.xlu0 %v366_v48, %s1148_s29  ;;  %v329_v48 = vld [vmem:[%s1530_s2] sm:$0xf] }
  0xba   : > { %423 = vrot.lane.b32.xlu0 %v1246_v19, %s1149_s30 }
  0xbe   : > { %524 = vperm.xlu0 %1126, %v330_v49  }
  0xfc   : > { %v498_v50 = vpop.permute.xlu1 %497 }
 0x100   : > { %v463_v51 = vpop.permute.xlu1 %462  ;;  %v502_v52 = vpop.permute.xlu0 %501 }
 0x104   : > { %v500_v53 = vpop.permute.xlu1 %499  ;;  %v459_v54 = vpop.permute.xlu0 %458 }
 0x105   : > { %v505_v6 = vsel %vm503_vm9, %v500_v53, %v502_v52  ;;  %v504_v9 = vsel %vm503_vm9, %v498_v50, %v500_v53 }
 0x108   : > { %v516_v55 = vpop.permute.xlu1 %515  ;;  %v461_v56 = vpop.permute.xlu0 %460 }
 0x109   : > { %v466_v26 = vsel %vm464_vm12, %v461_v56, %v463_v51  ;;  %v465_v28 = vsel %vm464_vm12, %v459_v54, %v461_v56 }
 0x10c   : > { %v491_v57 = vpop.permute.xlu1 %490  ;;  %v512_v58 = vpop.permute.xlu0 %511 }
 0x110   : > { %v473_v59 = vpop.permute.xlu1 %472  ;;  %v487_v60 = vpop.permute.xlu0 %486 }
 0x114   : > { %v448_v61 = vpop.permute.xlu1 %447  ;;  %v477_v62 = vpop.permute.xlu0 %476 }
 0x118   : > { %v438_v63 = vpop.permute.xlu1 %437  ;;  %v452_v0 = vpop.permute.xlu0 %451 }
 0x11c   : > { %v475_v1 = vpop.permute.xlu1 %474  ;;  %v514_v3 = vpop.permute.xlu0 %513 }
 0x11d   : > { %v519_v4 = vsel %vm517_vm8, %v514_v3, %v516_v55  ;;  %v518_v5 = vsel %vm517_vm8, %v512_v58, %v514_v3  ;;  %v480_v15 = vsel %vm478_vm11, %v475_v1, %v477_v62  ;;  %v479_v22 = vsel %vm478_vm11, %v473_v59, %v475_v1 }
 0x11e   : > { %545 = vmatprep.subr.mxu0 %v519_v4 }
 0x11f   : > { %546 = vmatpush1.msra.mxu0 %v518_v5 }
 0x120   : > { %v450_v7 = vpop.permute.xlu1 %449  ;;  %547 = vmatprep.subr.mxu0 %v505_v6  ;;  %v489_v8 = vpop.permute.xlu0 %488 }
 0x121   : > { %548 = vmatpush1.msra.mxu0 %v504_v9  ;;  %v494_v10 = vsel %vm492_vm10, %v489_v8, %v491_v57  ;;  %v493_v13 = vsel %vm492_vm10, %v487_v60, %v489_v8  ;;  %v455_v29 = vsel %vm453_vm13, %v450_v7, %v452_v0  ;;  %v454_v32 = vsel %vm453_vm13, %v448_v61, %v450_v7 }
 0x122   : > { %549 = vmatprep.subr.mxu0 %v494_v10 }
 0x123   : > { %550 = vmatpush1.msra.mxu0 %v493_v13 }
 0x124   : > { %551 = vmatprep.subr.mxu0 %v480_v15  ;;  %v434_v19 = vpop.permute.xlu0 %433  ;;  %v422_v25 = vpop.permute.xlu1 %421 }
 0x125   : > { %552 = vmatpush1.msra.mxu0 %v479_v22 }
 0x126   : > { %553 = vmatprep.subr.mxu0 %v466_v26 }
 0x127   : > { %554 = vmatpush1.msra.mxu0 %v465_v28 }
 0x128   : > { %555 = vmatprep.subr.mxu0 %v455_v29  ;;  %v436_v31 = vpop.permute.xlu0 %435  ;;  %v420_v38 = vpop.permute.xlu1 %419 }
 0x129   : > { %556 = vmatpush1.msra.mxu0 %v454_v32  ;;  %v441_v34 = vsel %vm439_vm14, %v436_v31, %v438_v63  ;;  %v440_v35 = vsel %vm439_vm14, %v434_v19, %v436_v31  ;;  %v426_v43 = vsel %vm425_vm15, %v420_v38, %v422_v25 }
 0x12a   : > { %557 = vmatprep.subr.mxu0 %v441_v34 }
 0x12b   : > { %558 = vmatpush1.msra.mxu0 %v440_v35 }
 0x12c   : > { %v424_v39 = vpop.permute.xlu0 %423 }
 0x12d   : > { %v427_v42 = vsel %vm425_vm15, %v422_v25, %v424_v39 }
 0x12e   : > { %559 = vmatprep.subr.mxu0 %v427_v42 }
 0x12f   : > { %560 = vmatpush1.msra.mxu0 %v426_v43 }
 0x130   : > { %561 = vmatprep.subr.mxu0 %v345_v45 }
 0x131   : > { %562 = vmatpush1.msra.mxu0 %v344_v47 }
 0x132   : > { %1093 = vmatmul.mubr.msk.f32.vlgmr.msra.gmra.mxu0 %vm527_vm1, %v329_v48 }
 0x139   : > { %v525_v49 = vpop.permute.xlu0 %524 }
 0x1f2   : > { %v597_v50 = vpop.f32.mrf.mxu0 }
 0x1f3   : > { %v598_v51 = vadd.f32 %v597_v50, %v525_v49 }
 0x1f4   : > { %v599_v52 = vpop.f32.mrf.mxu0 }
 0x1f5   : > { %v602_v53 = vmax.f32 %v598_v51, 0.0  ;;  %v600_v54 = vadd.f32 %v599_v52, %v525_v49 }
 0x1f7   : > { %606 = vrot.lane.b32.xlu1 %v602_v53, %s1136_s13  ;;  %v603_v16 = vmax.f32 %v600_v54, 0.0 }
 0x1fb   : > { %608 = vrot.lane.b32.xlu1 %v603_v16, %s1136_s13 }
 0x269   : > { %v607_v18 = vpop.permute.xlu1 %606 }
 0x26a   : > { %615 = vst.msk [vmem:[#allocation2] sm:$0xf] %vm614_vm2, %v607_v18 }
 0x26d   : > { %v609_v55 = vpop.permute.xlu1 %608 }
 0x26e   : > { %v610_v56 = vsel %vm309_vm0, %v607_v18, %v609_v55  ;;  %618 = vst.msk [vmem:[#allocation2 + $0x10] sm:$0xf] %vm617_vm3, %v609_v55 }
 0x26f   : > { %616 = vst [vmem:[#allocation2 + $0x8] sm:$0xf] %v610_v56 }
 0x271   : > { %v1377_v57 = vld [vmem:[#allocation2] sm:$0xf] }
 0x272   : > { %686 = vrot.lane.b32.xlu1 %v1377_v57, %s1143_s22  ;;  %v638_v58 = vmul.f32 %v1377_v57, %v1233_v14  ;;  %v635_v59 = vmul.f32 %v1377_v57, %v1254_v21  ;;  %v644_v60 = vrot.slane %v1377_v57, 4  ;;  %v626_v61 = vmul.f32 %v1377_v57, %v1326_v44 }
 0x273   : > { %v632_v62 = vmul.f32 %v1377_v57, %v1267_v24  ;;  %v629_v3 = vmul.f32 %v1377_v57, %v1281_v30 }
 0x274   : > { %738 = vrot.lane.b32.xlu0 %v638_v58, %s1144_s23 }
 0x275   : > { %v625_v63 = vld [vmem:[#allocation2 + $0x10] sm:$0xf]  ;;  %v699_v21 = vrot.slane %v632_v62, 4  ;;  %v673_v5 = vrot.slane %v629_v3, 4 }
 0x276   : > { %715 = vrot.lane.b32.xlu1 %v635_v59, %s1145_s24  ;;  %v1395_v0 = vld [vmem:[#allocation2 + $0x8] sm:$0xf]  ;;  %v640_v1 = vmul.f32 %v625_v63, %v1240_v17  ;;  %v628_v44 = vmul.f32 %v625_v63, %v1289_v33  ;;  %v637_v4 = vmul.f32 %v625_v63, %v1252_v20  ;;  %v646_v6 = vrot.slane %v625_v63, 4 }
 0x277   : > { %v639_v7 = vmul.f32 %v1395_v0, %v1299_v36  ;;  %v627_v30 = vmul.f32 %v1395_v0, %v1334_v46  ;;  %v636_v20 = vmul.f32 %v1395_v0, %v1313_v40  ;;  %v645_v33 = vrot.slane %v1395_v0, 4 }
 0x278   : > { %725 = vrot.lane.b32.xlu0 %v644_v60, %s1142_s21  ;;  %v633_v8 = vmul.f32 %v1395_v0, %v1303_v37  ;;  %v634_v9 = vmul.f32 %v625_v63, %v1262_v23  ;;  %v630_v46 = vmul.f32 %v1395_v0, %v1318_v41  ;;  %v631_v13 = vmul.f32 %v625_v63, %v1275_v27  ;;  %v620_v41 = vld [vmem:[%s1533_s5] sm:$0xf] }
 0x27a   : > { %660 = vrot.lane.b32.xlu1 %v626_v61, %s1148_s29  ;;  %v700_v10 = vrot.slane %v633_v8, 4  ;;  %v701_v40 = vrot.slane %v634_v9, 4  ;;  %v674_v15 = vrot.slane %v630_v46, 4  ;;  %v675_v19 = vrot.slane %v631_v13, 4  ;;  %v619_v13 = vld [vmem:[%s1532_s4] sm:$0xf] }
 0x27b   : > { %v624_v9 = vmul.f32 %v1395_v0, %v1227_v12  ;;  %v623_v46 = vmul.f32 %v1377_v57, %v1225_v11 }
 0x27c   : > { %690 = vrot.lane.b32.xlu0 %v625_v63, %s1143_s22 }
 0x27e   : > { %688 = vrot.lane.b32.xlu1 %v1395_v0, %s1143_s22 }
 0x280   : > { %702 = vrot.lane.b32.xlu0 %v699_v21, %s1146_s25 }
 0x282   : > { %742 = vrot.lane.b32.xlu1 %v640_v1, %s1144_s23 }
 0x284   : > { %664 = vrot.lane.b32.xlu0 %v628_v44, %s1148_s29 }
 0x286   : > { %719 = vrot.lane.b32.xlu1 %v637_v4, %s1145_s24 }
 0x288   : > { %676 = vrot.lane.b32.xlu0 %v673_v5, %s1147_s26 }
 0x28a   : > { %729 = vrot.lane.b32.xlu1 %v646_v6, %s1142_s21 }
 0x28c   : > { %740 = vrot.lane.b32.xlu0 %v639_v7, %s1144_s23 }
 0x28e   : > { %662 = vrot.lane.b32.xlu1 %v627_v30, %s1148_s29 }
 0x290   : > { %717 = vrot.lane.b32.xlu0 %v636_v20, %s1145_s24  ;;  %s305_s24 = scalar_lea.vmem %s1536_s8, %s1100_s9 }
 0x292   : > { %649 = vrot.lane.b32.xlu1 %v645_v33, %s1149_s30 }
 0x294   : > { %727 = vrot.lane.b32.xlu0 %v645_v33, %s1142_s21 }
 0x296   : > { %704 = vrot.lane.b32.xlu1 %v700_v10, %s1146_s25 }
 0x298   : > { %706 = vrot.lane.b32.xlu0 %v701_v40, %s1146_s25 }
 0x29a   : > { %678 = vrot.lane.b32.xlu1 %v674_v15, %s1147_s26 }
 0x29c   : > { %680 = vrot.lane.b32.xlu0 %v675_v19, %s1147_s26 }
 0x29e   : > { %647 = vrot.lane.b32.xlu1 %v644_v60, %s1149_s30 }
 0x2a0   : > { %651 = vrot.lane.b32.xlu0 %v646_v6, %s1149_s30 }
 0x2a4   : > { %757 = vperm.xlu0 %1126, %v620_v41  }
 0x2e4   : > { %v687_v22 = vpop.permute.xlu1 %686 }
 0x2e6   : > { %v739_v25 = vpop.permute.xlu0 %738 }
 0x2e8   : > { %v716_v27 = vpop.permute.xlu1 %715 }
 0x2ea   : > { %v726_v26 = vpop.permute.xlu0 %725 }
 0x2ec   : > { %v661_v28 = vpop.permute.xlu1 %660 }
 0x2ee   : > { %v691_v29 = vpop.permute.xlu0 %690 }
 0x2f0   : > { %v689_v31 = vpop.permute.xlu1 %688 }
 0x2f1   : > { %v693_v60 = vsel %vm464_vm12, %v689_v31, %v691_v29  ;;  %v692_v62 = vsel %vm464_vm12, %v687_v22, %v689_v31 }
 0x2f2   : > { %v703_v32 = vpop.permute.xlu0 %702 }
 0x2f4   : > { %v743_v34 = vpop.permute.xlu1 %742 }
 0x2f6   : > { %v665_v35 = vpop.permute.xlu0 %664 }
 0x2f8   : > { %v720_v38 = vpop.permute.xlu1 %719 }
 0x2fa   : > { %v677_v39 = vpop.permute.xlu0 %676 }
 0x2fc   : > { %v730_v42 = vpop.permute.xlu1 %729 }
 0x2fe   : > { %v741_v43 = vpop.permute.xlu0 %740 }
 0x2ff   : > { %v745_v45 = vsel %vm517_vm8, %v741_v43, %v743_v34  ;;  %v744_v47 = vsel %vm517_vm8, %v739_v25, %v741_v43 }
 0x300   : > { %1094 = vmatprep.subr.msk.mxu1 %vm746_vm4, %v745_v45  ;;  %v663_v48 = vpop.permute.xlu1 %662 }
 0x301   : > { %1095 = vmatpush1.msk.msra.mxu1 %vm746_vm4, %v744_v47  ;;  %v667_v4 = vsel %vm439_vm14, %v663_v48, %v665_v35  ;;  %v666_v6 = vsel %vm439_vm14, %v661_v28, %v663_v48 }
 0x302   : > { %v718_v49 = vpop.permute.xlu0 %717 }
 0x303   : > { %v721_v52 = vsel %vm492_vm10, %v716_v27, %v718_v49  ;;  %v722_v53 = vsel %vm492_vm10, %v718_v49, %v720_v38 }
 0x304   : > { %v650_v50 = vpop.permute.xlu1 %649 }
 0x306   : > { %v728_v51 = vpop.permute.xlu0 %727 }
 0x307   : > { %v731_v54 = vsel %vm503_vm9, %v726_v26, %v728_v51  ;;  %v732_v16 = vsel %vm503_vm9, %v728_v51, %v730_v42 }
 0x308   : > { %v705_v18 = vpop.permute.xlu1 %704  ;;  %v754_v55 = vsel %vm746_vm4, %v722_v53, %v732_v16  ;;  %v753_v56 = vsel %vm746_vm4, %v721_v52, %v731_v54 }
 0x309   : > { %792 = vmatprep.subr.mxu1 %v754_v55  ;;  %v708_v58 = vsel %vm478_vm11, %v703_v32, %v705_v18 }
 0x30a   : > { %v707_v59 = vpop.permute.xlu0 %706  ;;  %793 = vmatpush1.msra.mxu1 %v753_v56  ;;  %v751_v1 = vsel %vm746_vm4, %v692_v62, %v708_v58 }
 0x30b   : > { %v709_v61 = vsel %vm478_vm11, %v705_v18, %v707_v59 }
 0x30c   : > { %v679_v63 = vpop.permute.xlu1 %678  ;;  %v752_v21 = vsel %vm746_vm4, %v693_v60, %v709_v61 }
 0x30d   : > { %794 = vmatprep.subr.mxu1 %v752_v21  ;;  %v682_v44 = vsel %vm453_vm13, %v677_v39, %v679_v63  ;;  %v918_v21 = vld [vmem:[%s1535_s7] sm:$0xff] }
 0x30e   : > { %v681_v3 = vpop.permute.xlu0 %680  ;;  %795 = vmatpush1.msra.mxu1 %v751_v1  ;;  %v749_v20 = vsel %vm746_vm4, %v666_v6, %v682_v44 }
 0x30f   : > { %v683_v5 = vsel %vm453_vm13, %v679_v63, %v681_v3 }
 0x310   : > { %v648_v7 = vpop.permute.xlu1 %647  ;;  %v750_v30 = vsel %vm746_vm4, %v667_v4, %v683_v5 }
 0x311   : > { %796 = vmatprep.subr.mxu1 %v750_v30  ;;  %v653_v33 = vsel %vm425_vm15, %v648_v7, %v650_v50 }
 0x312   : > { %v652_v8 = vpop.permute.xlu0 %651  ;;  %797 = vmatpush1.msra.mxu1 %v749_v20  ;;  %v747_v15 = vsel %vm746_vm4, %v623_v46, %v653_v33 }
 0x313   : > { %v654_v10 = vsel %vm425_vm15, %v650_v50, %v652_v8  ;;  %v917_v8 = vld [vmem:[%s1534_s6] sm:$0xff] }
 0x314   : > { %v748_v40 = vsel %vm746_vm4, %v624_v9, %v654_v10 }
 0x315   : > { %798 = vmatprep.subr.mxu1 %v748_v40 }
 0x316   : > { %799 = vmatpush1.msra.mxu1 %v747_v15 }
 0x317   : > { %1096 = vmatmul.mubr.msk.f32.vlgmr.msra.gmra.mxu1 %vm760_vm5, %v619_v13 }
 0x318   : > { %1017 = vmatprep.mubr.f32.mxu1 %v1135_v2 }
 0x31f   : > { %v758_v12 = vpop.permute.xlu0 %757 }
 0x3d7   : > { %v834_v0 = vpop.f32.mrf.mxu1 }
 0x3d8   : > { %v835_v19 = vadd.f32 %v834_v0, %v758_v12 }
 0x3d9   : > { %v836_v41 = vpop.f32.mrf.mxu1 }
 0x3da   : > { %v839_v22 = vmax.f32 %v835_v19, 0.0  ;;  %v837_v11 = vadd.f32 %v836_v41, %v758_v12 }
 0x3dc   : > { %v840_v57 = vmax.f32 %v837_v11, 0.0  ;;  %843 = vrot.lane.b32.xlu1 %v839_v22, %s1136_s13 }
 0x3de   : > { %845 = vrot.lane.b32.xlu0 %v840_v57, %s1136_s13 }
 0x44e   : > { %v844_v25 = vpop.permute.xlu1 %843 }
 0x44f   : > { %851 = vst.msk [vmem:[#allocation2] sm:$0xf] %vm614_vm2, %v844_v25 }
 0x450   : > { %v846_v27 = vpop.permute.xlu0 %845 }
 0x451   : > { %v847_v26 = vsel %vm309_vm0, %v844_v25, %v846_v27  ;;  %853 = vst.msk [vmem:[#allocation2 + $0x10] sm:$0xf] %vm617_vm3, %v846_v27 }
 0x452   : > { %852 = vst [vmem:[#allocation2 + $0x8] sm:$0xf] %v847_v26 }
 0x456   : > { %v854_v2 = vld [vmem:[#allocation2] sm:$0xf] }
 0x457   : > { %883 = vrot.lane.b32.xlu1 %v854_v2, %s1147_s26  ;;  %v860_v28 = vmul.f32 %v854_v2, %v1233_v14 }
 0x458   : > { %v856_v29 = vld [vmem:[#allocation2 + $0x10] sm:$0xf] }
 0x459   : > { %887 = vrot.lane.b32.xlu0 %v856_v29, %s1147_s26  ;;  %v855_v31 = vld [vmem:[#allocation2 + $0x8] sm:$0xf]  ;;  %v897_v34 = vrot.slane %v860_v28, 4  ;;  %v862_v35 = vmul.f32 %v856_v29, %v1240_v17  ;;  %v859_v14 = vmul.f32 %v856_v29, %v1262_v23 }
 0x45a   : > { %v861_v32 = vmul.f32 %v855_v31, %v1299_v36  ;;  %v858_v39 = vmul.f32 %v855_v31, %v1303_v37  ;;  %v857_v36 = vmul.f32 %v854_v2, %v1267_v24 }
 0x45b   : > { %885 = vrot.lane.b32.xlu1 %v855_v31, %s1147_s26  ;;  %v899_v42 = vrot.slane %v862_v35, 4  ;;  %v868_v45 = vrot.slane %v859_v14, 4 }
 0x45c   : > { %v898_v38 = vrot.slane %v861_v32, 4  ;;  %v867_v43 = vrot.slane %v858_v39, 4  ;;  %v866_v17 = vrot.slane %v857_v36, 4 }
 0x45d   : > { %900 = vrot.lane.b32.xlu0 %v897_v34, %s1143_s22 }
 0x45f   : > { %902 = vrot.lane.b32.xlu1 %v898_v38, %s1143_s22 }
 0x461   : > { %904 = vrot.lane.b32.xlu0 %v899_v42, %s1143_s22 }
 0x463   : > { %871 = vrot.lane.b32.xlu1 %v867_v43, %s1149_s30 }
 0x465   : > { %873 = vrot.lane.b32.xlu0 %v868_v45, %s1149_s30 }
 0x467   : > { %869 = vrot.lane.b32.xlu1 %v866_v17, %s1149_s30 }
 0x4c9   : > { %v884_v47 = vpop.permute.xlu1 %883 }
 0x4cb   : > { %v888_v37 = vpop.permute.xlu0 %887 }
 0x4cd   : > { %v886_v48 = vpop.permute.xlu1 %885 }
 0x4ce   : > { %v890_v23 = vsel %vm453_vm13, %v886_v48, %v888_v37  ;;  %v889_v55 = vsel %vm453_vm13, %v884_v47, %v886_v48 }
 0x4cf   : > { %v901_v49 = vpop.permute.xlu0 %900 }
 0x4d1   : > { %v903_v50 = vpop.permute.xlu1 %902 }
 0x4d2   : > { %v906_v16 = vsel %vm464_vm12, %v901_v49, %v903_v50 }
 0x4d3   : > { %v905_v51 = vpop.permute.xlu0 %904  ;;  %v914_v59 = vsel %vm746_vm4, %v889_v55, %v906_v16 }
 0x4d4   : > { %v907_v52 = vsel %vm464_vm12, %v903_v50, %v905_v51  ;;  %v916_v24 = vsel %vm746_vm4, %v888_v37, %v905_v51 }
 0x4d5   : > { %940 = vrot.lane.b32.xlu1 %v916_v24, %s1143_s22  ;;  %v872_v53 = vpop.permute.xlu1 %871  ;;  %v915_v54 = vsel %vm746_vm4, %v890_v23, %v907_v52 }
 0x4d6   : > { %938 = vrot.lane.b32.xlu0 %v915_v54, %s1143_s22 }
 0x4d7   : > { %v874_v18 = vpop.permute.xlu0 %873 }
 0x4d8   : > { %v876_v56 = vsel %vm425_vm15, %v872_v53, %v874_v18  ;;  %v913_v62 = vsel %vm746_vm4, %v856_v29, %v874_v18 }
 0x4d9   : > { %v870_v58 = vpop.permute.xlu1 %869  ;;  %v912_v60 = vsel %vm746_vm4, %v855_v31, %v876_v56 }
 0x4da   : > { %v875_v61 = vsel %vm425_vm15, %v870_v58, %v872_v53  ;;  %936 = vrot.lane.b32.xlu0 %v914_v59, %s1143_s22  ;;  %932 = vrot.lane.b32.xlu1 %v912_v60, %s1143_s22 }
 0x4db   : > { %v911_v63 = vsel %vm746_vm4, %v854_v2, %v875_v61 }
 0x4de   : > { %934 = vrot.lane.b32.xlu0 %v913_v62, %s1143_s22  ;;  %930 = vrot.lane.b32.xlu1 %v911_v63, %s1143_s22 }
 0x4e2   : > { %921 = vperm.xlu0 %1126, %v918_v21  }
 0x547   : > { %v941_v1 = vpop.permute.xlu1 %940 }
 0x548   : > { %v939_v44 = vpop.permute.xlu0 %938 }
 0x549   : > { %v945_v3 = vsel %vm464_vm12, %v939_v44, %v941_v1 }
 0x54a   : > { %981 = vmatprep.subr.mxu1 %v945_v3 }
 0x54c   : > { %v937_v4 = vpop.permute.xlu0 %936  ;;  %v933_v5 = vpop.permute.xlu1 %932 }
 0x54d   : > { %v944_v6 = vsel %vm464_vm12, %v937_v4, %v939_v44 }
 0x54e   : > { %982 = vmatpush1.msra.mxu1 %v944_v6 }
 0x550   : > { %v935_v7 = vpop.permute.xlu0 %934  ;;  %v931_v30 = vpop.permute.xlu1 %930 }
 0x551   : > { %v942_v20 = vsel %vm464_vm12, %v931_v30, %v933_v5  ;;  %v943_v33 = vsel %vm464_vm12, %v933_v5, %v935_v7 }
 0x552   : > { %983 = vmatprep.subr.mxu1 %v943_v33 }
 0x553   : > { %984 = vmatpush1.msra.mxu1 %v942_v20 }
 0x554   : > { %1097 = vmatmul.mubr.msk.f32.vlgmr.msra.gmra.mxu1 %vm372_vm6, %v917_v8 }
 0x55d   : > { %v922_v9 = vpop.permute.xlu0 %921 }
 0x614   : > { %v1019_v10 = vpop.f32.mrf.mxu1 }
 0x615   : > { %v1020_v46 = vadd.f32 %v1019_v10, %v922_v9 }
 0x616   : > { %v1021_v40 = vpop.f32.mrf.mxu1 }
 0x617   : > { %v1024_v13 = vmax.f32 %v1020_v46, 0.0  ;;  %v1022_v15 = vadd.f32 %v1021_v40, %v922_v9 }
 0x619   : > { %1026 = vst [vmem:[%s305_s24] sm:$0xff] %v1024_v13  ;;  %v1025_v12 = vmax.f32 %v1022_v15, 0.0 }
 0x61b   : > { %1027 = vst [vmem:[%s305_s24 + $0x8] sm:$0xff] %v1025_v12 }
 0x61c PF: > { %s18_s27 = sadd.s32 1, %s1133_s27  }
 0x61d   : > { %p15_p4 = scmp.ge.s32.totalorder %s18_s27, 4  }
 0x61f   :  { %17 = sbr.rel (!%p15_p4) target bundleno = 1 (0x1), region = 83 }

</bundles_post_ra>
